<compile_context>
chip_gen: v5e
topology: v5e:2x2
jax: 0.10.0
libtpu: 0.0.40
codegen_flags: <defaults>
</compile_context>

<pallas_src>
import functools

import jax
import jax.numpy as jnp
from jax.experimental import pallas as pl
from jax.experimental.pallas import tpu as pltpu


LEAKY_SLOPE = 0.01
BN_EPS = 1e-5
LANE = 128


def _round_up(x, m):
    return ((x + m - 1) // m) * m


def _leaky_relu(x):
    # Exact for 0 < slope < 1: mul + max (2 VALU ops) instead of cmp+mul+select.
    return jnp.maximum(x, LEAKY_SLOPE * x)


def _bn_normalize(x):
    # BatchNorm1d (training mode, biased batch variance) with the affine already
    # folded into the following linear layer: returns (x - mean) * rsqrt(var+eps).
    # One-pass stats: both cross-sublane reductions issue from the same tensor.
    inv_n = 1.0 / x.shape[0]
    mean = jnp.sum(x, axis=0, keepdims=True) * inv_n
    mean_sq = jnp.sum(x * x, axis=0, keepdims=True) * inv_n
    var = mean_sq - mean * mean
    return (x - mean) * jax.lax.rsqrt(var + BN_EPS)


def generator2_kernel(z_ref, w1_ref, w2_ref, w3_ref, vec_ref, out_ref, *,
                      fc_pad, tfc_pad, out_pad):
    # Static, lane-aligned slices of the packed (1, C_total) f32 bias bank.
    b1 = vec_ref[:, 0:fc_pad]
    b2 = vec_ref[:, fc_pad:fc_pad + tfc_pad]
    b3 = vec_ref[:, fc_pad + tfc_pad:fc_pad + tfc_pad + out_pad]

    z = z_ref[...]                                                       # (B, k_pad) bf16

    # --- Block 1: Linear -> LeakyReLU -> BatchNorm (affine folded forward) ---
    h1 = jnp.dot(z, w1_ref[...], preferred_element_type=jnp.float32) + b1
    h1 = _bn_normalize(_leaky_relu(h1))                                  # (B, fc_pad) f32

    # --- Block 2: Linear (w2 pre-scaled by gamma1, b2 += beta1 @ w2) ---
    h2 = jnp.dot(h1.astype(jnp.bfloat16), w2_ref[...],
                 preferred_element_type=jnp.float32) + b2
    h2 = _bn_normalize(_leaky_relu(h2))                                  # (B, tfc_pad) f32

    # --- Block 3: Linear (w3 pre-scaled by gamma2) -> LeakyReLU, lane-padded N ---
    h3 = jnp.dot(h2.astype(jnp.bfloat16), w3_ref[...],
                 preferred_element_type=jnp.float32) + b3
    out_ref[...] = _leaky_relu(h3).astype(out_ref.dtype)


def prepare_params(params, z_size):
    """One-time prep (hoisted out of the forward): fold BN affines into the next
    linear, zero-pad every feature dim to a multiple of 128 lanes, cast MXU
    operands to bf16, and pack the bias vectors into one (1, C_total) f32 array."""
    w1, b1 = params["w1"], params["b1"]
    w2, b2 = params["w2"], params["b2"]
    w3, b3 = params["w3"], params["b3"]
    g1, be1 = params["g1"], params["be1"]
    g2, be2 = params["g2"], params["be2"]

    fc = w1.shape[1]
    tfc = w2.shape[1]
    input_feat = w3.shape[1]

    k_pad = _round_up(z_size, LANE)
    fc_pad = _round_up(fc, LANE)
    tfc_pad = _round_up(tfc, LANE)
    out_pad = _round_up(input_feat, LANE)

    # Fold BN1 affine into Linear2 and BN2 affine into Linear3 (exact algebra, f32).
    w2f = w2 * g1.T
    b2f = b2 + be1 @ w2
    w3f = w3 * g2.T
    b3f = b3 + be2 @ w3

    # Zero-pad to lane-dense shapes (padded cols stay exactly zero end-to-end).
    w1p = jnp.zeros((k_pad, fc_pad), jnp.float32).at[:z_size, :fc].set(w1)
    w2p = jnp.zeros((fc_pad, tfc_pad), jnp.float32).at[:fc, :tfc].set(w2f)
    w3p = jnp.zeros((tfc_pad, out_pad), jnp.float32).at[:tfc, :input_feat].set(w3f)

    b1p = jnp.zeros((1, fc_pad), jnp.float32).at[:, :fc].set(b1)
    b2p = jnp.zeros((1, tfc_pad), jnp.float32).at[:, :tfc].set(b2f)
    b3p = jnp.zeros((1, out_pad), jnp.float32).at[:, :input_feat].set(b3f)
    vec = jnp.concatenate([b1p, b2p, b3p], axis=1)          # (1, fc_pad+tfc_pad+out_pad)

    return {
        "w1": w1p.astype(jnp.bfloat16),
        "w2": w2p.astype(jnp.bfloat16),
        "w3": w3p.astype(jnp.bfloat16),
        "vec": vec,
    }


@functools.partial(jax.jit, static_argnames=("input_feat",))
def generator2_forward(z, w1, w2, w3, vec, *, input_feat):
    """z: (B, z_size) f32; w1/w2/w3/vec from prepare_params."""
    B = z.shape[0]
    k_pad, fc_pad = w1.shape
    tfc_pad = w2.shape[1]
    out_pad = w3.shape[1]

    # Lane-dense LHS for the first matmul (K padded to 128).
    zp = jnp.zeros((B, k_pad), jnp.bfloat16).at[:, :z.shape[1]].set(
        z.astype(jnp.bfloat16))

    kernel = functools.partial(generator2_kernel, fc_pad=fc_pad,
                               tfc_pad=tfc_pad, out_pad=out_pad)
    vmem = pl.BlockSpec(memory_space=pltpu.MemorySpace.VMEM)
    out = pl.pallas_call(
        kernel,
        out_shape=jax.ShapeDtypeStruct((B, out_pad), jnp.float32),
        in_specs=[vmem] * 5,
        out_specs=vmem,
    )(zp, w1, w2, w3, vec)
    return out[:, :input_feat]


def init_params(key, z_size, fc_units=128, input_feat=26):
    """Deterministic synthetic init (uniform, same shapes as the PyTorch module)."""
    ks = jax.random.split(key, 6)

    def lin(kw, kb, fan_in, fan_out):
        bound = 1.0 / (fan_in ** 0.5)
        w = jax.random.uniform(kw, (fan_in, fan_out), jnp.float32, -bound, bound)
        b = jax.random.uniform(kb, (1, fan_out), jnp.float32, -bound, bound)
        return w, b

    w1, b1 = lin(ks[0], ks[1], z_size, fc_units)
    w2, b2 = lin(ks[2], ks[3], fc_units, 2 * fc_units)
    w3, b3 = lin(ks[4], ks[5], 2 * fc_units, input_feat)

    return {
        "w1": w1, "b1": b1,
        "g1": jnp.ones((1, fc_units), jnp.float32),
        "be1": jnp.zeros((1, fc_units), jnp.float32),
        "w2": w2, "b2": b2,
        "g2": jnp.ones((1, 2 * fc_units), jnp.float32),
        "be2": jnp.zeros((1, 2 * fc_units), jnp.float32),
        "w3": w3, "b3": b3,
    }


def generator2_reference(z, p):
    """Pure-JAX f32 reference with the original (unfolded) module formulation."""
    def bn(x, gamma, beta):
        mean = jnp.mean(x, axis=0, keepdims=True)
        var = jnp.mean((x - mean) ** 2, axis=0, keepdims=True)
        return (x - mean) / jnp.sqrt(var + BN_EPS) * gamma + beta

    h = _leaky_relu(z @ p["w1"] + p["b1"])
    h = bn(h, p["g1"], p["be1"])
    h = _leaky_relu(h @ p["w2"] + p["b2"])
    h = bn(h, p["g2"], p["be2"])
    return _leaky_relu(h @ p["w3"] + p["b3"])


if __name__ == "__main__":
    B = 128          # fills the MXU M dimension (use 256 on v6e/v7x if batch allows)
    Z_SIZE = 32
    FC_UNITS = 128
    INPUT_FEAT = 26

    key = jax.random.PRNGKey(0)
    k_z, k_p = jax.random.split(key)

    z = jax.random.normal(k_z, (B, Z_SIZE), jnp.float32)
    params = init_params(k_p, Z_SIZE, FC_UNITS, INPUT_FEAT)

    # One-time weight prep (padding / bf16 casts / BN folding), outside the jit call.
    prep = prepare_params(params, Z_SIZE)

    out = generator2_forward(z, prep["w1"], prep["w2"], prep["w3"], prep["vec"],
                             input_feat=INPUT_FEAT)
    out = jax.block_until_ready(out)

    assert out.shape == (B, INPUT_FEAT) and out.dtype == jnp.float32
    assert bool(jnp.all(jnp.isfinite(out)))

    # Loose tolerance: bf16 MXU inputs vs. the pure-f32 reference.
    ref = generator2_reference(z, params)
    max_err = float(jnp.max(jnp.abs(out - ref)))
    assert max_err < 0.25, f"max abs error vs f32 reference: {max_err}"

    print("KERNEL_OK")
</pallas_src>

<mosaic_0001>
module attributes {stable_mosaic.version = 11 : i64} {
  func.func @generator2_kernel(%arg0: memref<128x128xbf16, #tpu.memory_space<vmem>>, %arg1: memref<128x128xbf16, #tpu.memory_space<vmem>>, %arg2: memref<128x256xbf16, #tpu.memory_space<vmem>>, %arg3: memref<256x128xbf16, #tpu.memory_space<vmem>>, %arg4: memref<1x512xf32, #tpu.memory_space<vmem>>, %arg5: memref<128x128xf32, #tpu.memory_space<vmem>>) attributes {dimension_semantics = [], scalar_prefetch = 0 : i64, scratch_operands = 0 : i64, tpu.core_type = #tpu.core_type<tc>} {
    %c0 = arith.constant 0 : index
    %c0_0 = arith.constant 0 : index
    %0 = vector.load %arg4[%c0, %c0_0] : memref<1x512xf32, #tpu.memory_space<vmem>>, vector<1x128xf32>
    %c0_1 = arith.constant 0 : index
    %c128 = arith.constant 128 : index
    %1 = vector.load %arg4[%c0_1, %c128] : memref<1x512xf32, #tpu.memory_space<vmem>>, vector<1x256xf32>
    %c0_2 = arith.constant 0 : index
    %c384 = arith.constant 384 : index
    %2 = vector.load %arg4[%c0_2, %c384] : memref<1x512xf32, #tpu.memory_space<vmem>>, vector<1x128xf32>
    %c0_3 = arith.constant 0 : index
    %c0_4 = arith.constant 0 : index
    %3 = vector.load %arg0[%c0_3, %c0_4] : memref<128x128xbf16, #tpu.memory_space<vmem>>, vector<128x128xbf16>
    %c0_5 = arith.constant 0 : index
    %c0_6 = arith.constant 0 : index
    %4 = vector.load %arg1[%c0_5, %c0_6] : memref<128x128xbf16, #tpu.memory_space<vmem>>, vector<128x128xbf16>
    %cst = arith.constant dense<0.000000e+00> : vector<128x128xf32>
    %5 = tpu.matmul %3, %4, %cst {dimension_numbers = #tpu.dot_dimension_numbers<[1], [0], [0], [1], [0, 0, 1, 1], [], []>} : vector<128x128xbf16>, vector<128x128xbf16>, vector<128x128xf32> -> vector<128x128xf32>
    %6 = vector.broadcast %0 : vector<1x128xf32> to vector<128x128xf32>
    %7 = arith.addf %5, %6 : vector<128x128xf32>
    %cst_7 = arith.constant 0.00999999977 : f32
    %8 = vector.broadcast %cst_7 : f32 to vector<128x128xf32>
    %9 = arith.mulf %8, %7 : vector<128x128xf32>
    %10 = arith.maximumf %7, %9 : vector<128x128xf32>
    %cst_8 = arith.constant dense<0.000000e+00> : vector<128xf32>
    %11 = vector.multi_reduction <add>, %10, %cst_8 [0] : vector<128x128xf32> to vector<128xf32>
    %12 = vector.shape_cast %11 : vector<128xf32> to vector<1x128xf32>
    %cst_9 = arith.constant 7.812500e-03 : f32
    %13 = vector.broadcast %cst_9 : f32 to vector<1x128xf32>
    %14 = arith.mulf %12, %13 : vector<1x128xf32>
    %15 = arith.mulf %10, %10 : vector<128x128xf32>
    %cst_10 = arith.constant dense<0.000000e+00> : vector<128xf32>
    %16 = vector.multi_reduction <add>, %15, %cst_10 [0] : vector<128x128xf32> to vector<128xf32>
    %17 = vector.shape_cast %16 : vector<128xf32> to vector<1x128xf32>
    %cst_11 = arith.constant 7.812500e-03 : f32
    %18 = vector.broadcast %cst_11 : f32 to vector<1x128xf32>
    %19 = arith.mulf %17, %18 : vector<1x128xf32>
    %20 = arith.mulf %14, %14 : vector<1x128xf32>
    %21 = arith.subf %19, %20 : vector<1x128xf32>
    %22 = vector.broadcast %14 : vector<1x128xf32> to vector<128x128xf32>
    %23 = arith.subf %10, %22 : vector<128x128xf32>
    %cst_12 = arith.constant 9.99999974E-6 : f32
    %24 = vector.broadcast %cst_12 : f32 to vector<1x128xf32>
    %25 = arith.addf %21, %24 : vector<1x128xf32>
    %26 = math.rsqrt %25 : vector<1x128xf32>
    %27 = vector.broadcast %26 : vector<1x128xf32> to vector<128x128xf32>
    %28 = arith.mulf %23, %27 : vector<128x128xf32>
    %29 = arith.truncf %28 : vector<128x128xf32> to vector<128x128xbf16>
    %c0_13 = arith.constant 0 : index
    %c0_14 = arith.constant 0 : index
    %30 = vector.load %arg2[%c0_13, %c0_14] : memref<128x256xbf16, #tpu.memory_space<vmem>>, vector<128x256xbf16>
    %cst_15 = arith.constant dense<0.000000e+00> : vector<128x256xf32>
    %31 = tpu.matmul %29, %30, %cst_15 {dimension_numbers = #tpu.dot_dimension_numbers<[1], [0], [0], [1], [0, 0, 1, 1], [], []>} : vector<128x128xbf16>, vector<128x256xbf16>, vector<128x256xf32> -> vector<128x256xf32>
    %32 = vector.broadcast %1 : vector<1x256xf32> to vector<128x256xf32>
    %33 = arith.addf %31, %32 : vector<128x256xf32>
    %cst_16 = arith.constant 0.00999999977 : f32
    %34 = vector.broadcast %cst_16 : f32 to vector<128x256xf32>
    %35 = arith.mulf %34, %33 : vector<128x256xf32>
    %36 = arith.maximumf %33, %35 : vector<128x256xf32>
    %cst_17 = arith.constant dense<0.000000e+00> : vector<256xf32>
    %37 = vector.multi_reduction <add>, %36, %cst_17 [0] : vector<128x256xf32> to vector<256xf32>
    %38 = vector.shape_cast %37 : vector<256xf32> to vector<1x256xf32>
    %cst_18 = arith.constant 7.812500e-03 : f32
    %39 = vector.broadcast %cst_18 : f32 to vector<1x256xf32>
    %40 = arith.mulf %38, %39 : vector<1x256xf32>
    %41 = arith.mulf %36, %36 : vector<128x256xf32>
    %cst_19 = arith.constant dense<0.000000e+00> : vector<256xf32>
    %42 = vector.multi_reduction <add>, %41, %cst_19 [0] : vector<128x256xf32> to vector<256xf32>
    %43 = vector.shape_cast %42 : vector<256xf32> to vector<1x256xf32>
    %cst_20 = arith.constant 7.812500e-03 : f32
    %44 = vector.broadcast %cst_20 : f32 to vector<1x256xf32>
    %45 = arith.mulf %43, %44 : vector<1x256xf32>
    %46 = arith.mulf %40, %40 : vector<1x256xf32>
    %47 = arith.subf %45, %46 : vector<1x256xf32>
    %48 = vector.broadcast %40 : vector<1x256xf32> to vector<128x256xf32>
    %49 = arith.subf %36, %48 : vector<128x256xf32>
    %cst_21 = arith.constant 9.99999974E-6 : f32
    %50 = vector.broadcast %cst_21 : f32 to vector<1x256xf32>
    %51 = arith.addf %47, %50 : vector<1x256xf32>
    %52 = math.rsqrt %51 : vector<1x256xf32>
    %53 = vector.broadcast %52 : vector<1x256xf32> to vector<128x256xf32>
    %54 = arith.mulf %49, %53 : vector<128x256xf32>
    %55 = arith.truncf %54 : vector<128x256xf32> to vector<128x256xbf16>
    %c0_22 = arith.constant 0 : index
    %c0_23 = arith.constant 0 : index
    %56 = vector.load %arg3[%c0_22, %c0_23] : memref<256x128xbf16, #tpu.memory_space<vmem>>, vector<256x128xbf16>
    %cst_24 = arith.constant dense<0.000000e+00> : vector<128x128xf32>
    %57 = tpu.matmul %55, %56, %cst_24 {dimension_numbers = #tpu.dot_dimension_numbers<[1], [0], [0], [1], [0, 0, 1, 1], [], []>} : vector<128x256xbf16>, vector<256x128xbf16>, vector<128x128xf32> -> vector<128x128xf32>
    %58 = vector.broadcast %2 : vector<1x128xf32> to vector<128x128xf32>
    %59 = arith.addf %57, %58 : vector<128x128xf32>
    %cst_25 = arith.constant 0.00999999977 : f32
    %60 = vector.broadcast %cst_25 : f32 to vector<128x128xf32>
    %61 = arith.mulf %60, %59 : vector<128x128xf32>
    %62 = arith.maximumf %59, %61 : vector<128x128xf32>
    %c0_26 = arith.constant 0 : index
    %c0_27 = arith.constant 0 : index
    %63 = vector.load %arg5[%c0_26, %c0_27] : memref<128x128xf32, #tpu.memory_space<vmem>>, vector<128x128xf32>
    tpu.vector_store %arg5[%c0_26, %c0_27], %62 {strides = array<i32>} : memref<128x128xf32, #tpu.memory_space<vmem>>, vector<128x128xf32>,
    return
  }
}

</mosaic_0001>

<bundles_post_ra>
// kernel: generator2_forward.1
= control target key start
LH: loop header
LB: loop body
LE: loop exit
PB: predicated region body
PF: predicated region fallthrough
CT: control target
= control target key end

     0   :  { %s2142_s1 = inlined_call_operand.vmem [shape: bf16[128,128], index: 1, kind: input, shape index: {}]   ;;  %s2143_s4 = inlined_call_operand.vmem [shape: f32[1,512], index: 4, kind: input, shape index: {}]   ;;  %s2144_s0 = inlined_call_operand.vmem [shape: bf16[128,128], index: 0, kind: input, shape index: {}]   ;;  %s2145_s2 = inlined_call_operand.vmem [shape: bf16[128,256], index: 2, kind: input, shape index: {}]   ;;  %s2146_s3 = inlined_call_operand.vmem [shape: bf16[256,128], index: 3, kind: input, shape index: {}]   ;;  %s2147_s5 = inlined_call_operand.vmem [shape: f32[128,128], index: 5, kind: output, shape index: {}]  }
   0x1   :  { %v1325_v0 = vld [vmem:[%s2142_s1 + $0x38] sm:$0xff]  ;;  %v1324_v1 = vld [vmem:[%s2142_s1 + $0x30] sm:$0xff]  ;;  %v1323_v2 = vld [vmem:[%s2142_s1 + $0x28] sm:$0xff] }
   0x2   :  { %154 = vmatpush.bf16.msra.mxu0 %v1325_v0  ;;  %1358 = vmatpush.bf16.msra.mxu1 %v1325_v0  ;;  %v1322_v3 = vld [vmem:[%s2142_s1 + $0x20] sm:$0xff]  ;;  %v1321_v4 = vld [vmem:[%s2142_s1 + $0x18] sm:$0xff]  ;;  %v1320_v5 = vld [vmem:[%s2142_s1 + $0x10] sm:$0xff] }
   0x3   :  { %1359 = vmatpush.bf16.msra.mxu2 %v1325_v0  ;;  %1360 = vmatpush.bf16.msra.mxu3 %v1325_v0  ;;  %v1319_v6 = vld [vmem:[%s2142_s1 + $0x8] sm:$0xff]  ;;  %v1318_v7 = vld [vmem:[%s2142_s1] sm:$0xff]  ;;  %v1312_v9 = vld [vmem:[%s2144_s0 + $0x10] sm:$0xff] }
   0x4   :  { %v1310_v8 = vld [vmem:[%s2144_s0] sm:$0xff]  ;;  %v1316_v11 = vld [vmem:[%s2144_s0 + $0x30] sm:$0xff]  ;;  %v1311_v12 = vld [vmem:[%s2144_s0 + $0x8] sm:$0xff] }
   0x5   :  { %v1314_v10 = vld [vmem:[%s2144_s0 + $0x20] sm:$0xff]  ;;  %v1313_v13 = vld [vmem:[%s2144_s0 + $0x18] sm:$0xff]  ;;  %v1315_v14 = vld [vmem:[%s2144_s0 + $0x28] sm:$0xff] }
   0x6   :  { %155 = vmatpush.bf16.msra.mxu0 %v1324_v1  ;;  %1361 = vmatpush.bf16.msra.mxu1 %v1324_v1  ;;  %v1317_v15 = vld [vmem:[%s2144_s0 + $0x38] sm:$0xff]  ;;  %v1471_v22 = vld [vmem:[%s2143_s4] ss:$0 sm:$0xff] }
   0x7   :  { %1362 = vmatpush.bf16.msra.mxu2 %v1324_v1  ;;  %1363 = vmatpush.bf16.msra.mxu3 %v1324_v1 }
   0xa   :  { %156 = vmatpush.bf16.msra.mxu0 %v1323_v2  ;;  %1364 = vmatpush.bf16.msra.mxu1 %v1323_v2 }
   0xb   :  { %1365 = vmatpush.bf16.msra.mxu2 %v1323_v2  ;;  %1366 = vmatpush.bf16.msra.mxu3 %v1323_v2 }
   0xe   :  { %157 = vmatpush.bf16.msra.mxu0 %v1322_v3  ;;  %1367 = vmatpush.bf16.msra.mxu1 %v1322_v3 }
   0xf   :  { %1368 = vmatpush.bf16.msra.mxu2 %v1322_v3  ;;  %1369 = vmatpush.bf16.msra.mxu3 %v1322_v3 }
  0x12   :  { %158 = vmatpush.bf16.msra.mxu0 %v1321_v4  ;;  %1370 = vmatpush.bf16.msra.mxu1 %v1321_v4 }
  0x13   :  { %1371 = vmatpush.bf16.msra.mxu2 %v1321_v4  ;;  %1372 = vmatpush.bf16.msra.mxu3 %v1321_v4 }
  0x16   :  { %159 = vmatpush.bf16.msra.mxu0 %v1320_v5  ;;  %1373 = vmatpush.bf16.msra.mxu1 %v1320_v5 }
  0x17   :  { %1374 = vmatpush.bf16.msra.mxu2 %v1320_v5  ;;  %1375 = vmatpush.bf16.msra.mxu3 %v1320_v5 }
  0x1a   :  { %160 = vmatpush.bf16.msra.mxu0 %v1319_v6  ;;  %1376 = vmatpush.bf16.msra.mxu1 %v1319_v6 }
  0x1b   :  { %1377 = vmatpush.bf16.msra.mxu2 %v1319_v6  ;;  %1378 = vmatpush.bf16.msra.mxu3 %v1319_v6 }
  0x1e   :  { %161 = vmatpush.bf16.msra.mxu0 %v1318_v7  ;;  %1379 = vmatpush.bf16.msra.mxu1 %v1318_v7 }
  0x1f   :  { %1380 = vmatpush.bf16.msra.mxu2 %v1318_v7  ;;  %1381 = vmatpush.bf16.msra.mxu3 %v1318_v7 }
  0x21   :  { %162 = vmatmul.bf16.vlgmr.msra.gmra.mxu0 %v1310_v8  ;;  %172 = vmatmul.bf16.vlgmr.msra.gmra.mxu1 %v1312_v9 }
  0x22   :  { %182 = vmatmul.bf16.vlgmr.msra.gmra.mxu2 %v1314_v10  ;;  %192 = vmatmul.bf16.vlgmr.msra.gmra.mxu3 %v1316_v11  ;;  %v1240_v11 = vld [vmem:[%s2145_s2 + $0x70] sm:$0xf] }
  0x31   :  { %167 = vmatmul.bf16.gmra.mxu0 %v1311_v12  ;;  %177 = vmatmul.bf16.gmra.mxu1 %v1313_v13 }
  0x32   :  { %187 = vmatmul.bf16.gmra.mxu2 %v1315_v14  ;;  %197 = vmatmul.bf16.gmra.mxu3 %v1317_v15 }
  0x9e   :  { %v163_v16 = vpop.f32.mrf.mxu0  ;;  %v173_v17 = vpop.f32.mrf.mxu1 }
  0x9f   :  { %v164_v24 = vadd.f32 %v1471_v22, %v163_v16  ;;  %v174_v33 = vadd.f32 %v1471_v22, %v173_v17  ;;  %v1341_v16 = vld [vmem:[%s2145_s2 + $0x74] sm:$0xf0]  ;;  %v1340_v17 = vld [vmem:[%s2145_s2 + $0x74] sm:$0xf] }
  0xa1   :  { %v203_v30 = vmul.f32 0.01, %v164_v24  ;;  %v207_v39 = vmul.f32 0.01, %v174_v33 }
  0xa3   :  { %v1479_v35 = vmax.f32 %v164_v24, %v203_v30  ;;  %v1495_v51 = vmax.f32 %v174_v33, %v207_v39  ;;  %v1338_v33 = vld [vmem:[%s2145_s2 + $0x64] sm:$0xf] }
  0xa5   :  { %v183_v18 = vpop.f32.mrf.mxu2  ;;  %v193_v19 = vpop.f32.mrf.mxu3  ;;  %v257_v45 = vmul.f32 %v1479_v35, %v1479_v35  ;;  %v261_v1 = vmul.f32 %v1495_v51, %v1495_v51 }
  0xa6   :  { %v165_v20 = vpop.f32.mrf.mxu0  ;;  %v175_v21 = vpop.f32.mrf.mxu1  ;;  %v184_v52 = vadd.f32 %v1471_v22, %v183_v18  ;;  %v1503_v59 = vadd.f32 %v1471_v22, %v193_v19  ;;  %v1242_v18 = vld [vmem:[%s2145_s2 + $0x78] sm:$0xf0] }
  0xa7   :  { %v166_v23 = vadd.f32 %v1471_v22, %v165_v20  ;;  %v176_v36 = vadd.f32 %v1471_v22, %v175_v21  ;;  %v1241_v21 = vor.u32 %v1341_v16, %v1240_v11 }
  0xa8   :  { %v211_v2 = vmul.f32 0.01, %v184_v52  ;;  %v215_v9 = vmul.f32 0.01, %v1503_v59 }
  0xa9   :  { %v204_v28 = vmul.f32 0.01, %v166_v23  ;;  %v208_v48 = vmul.f32 0.01, %v176_v36  ;;  %449 = vmatpush.bf16.msrb.mxu1 %v1241_v21 }
  0xaa   :  { %v1535_v19 = vmax.f32 %v184_v52, %v211_v2  ;;  %v1224_v52 = vld [vmem:[%s2145_s2 + $0x50] sm:$0xf] }
  0xab   :  { %v1477_v34 = vmax.f32 %v166_v23, %v204_v28  ;;  %v1505_v61 = vmax.f32 %v176_v36, %v208_v48  ;;  %v1245_v23 = vor.u32 %v1340_v17, %v1242_v18 }
  0xad   :  { %v185_v25 = vpop.f32.mrf.mxu2  ;;  %v195_v31 = vpop.f32.mrf.mxu3  ;;  %v258_v42 = vmul.f32 %v1477_v34, %v1477_v34  ;;  %v235_v47 = vadd.f32 %v1477_v34, %v1479_v35  ;;  %v262_v12 = vmul.f32 %v1505_v61, %v1505_v61  ;;  %498 = vmatpush.bf16.msrb.mxu2 %v1245_v23  ;;  %v1208_v23 = vld [vmem:[%s2145_s2 + $0x30] sm:$0xf] }
  0xae   :  { %v168_v26 = vpop.f32.mrf.mxu0  ;;  %v178_v27 = vpop.f32.mrf.mxu1  ;;  %v186_v58 = vadd.f32 %v1471_v22, %v185_v25  ;;  %v196_v20 = vadd.f32 %v1471_v22, %v195_v31  ;;  %v1232_v31 = vld [vmem:[%s2145_s2 + $0x60] sm:$0xf] }
  0xaf   :  { %v169_v29 = vadd.f32 %v1471_v22, %v168_v26  ;;  %v179_v43 = vadd.f32 %v1471_v22, %v178_v27  ;;  %v273_v54 = vadd.f32 %v258_v42, %v257_v45  ;;  %v265_v42 = vmul.f32 %v1535_v19, %v1535_v19 }
  0xb0   :  { %v212_v8 = vmul.f32 0.01, %v186_v58 }
  0xb1   :  { %v205_v32 = vmul.f32 0.01, %v169_v29  ;;  %v209_v56 = vmul.f32 0.01, %v179_v43 }
  0xb2   :  { %v1541_v28 = vmax.f32 %v186_v58, %v212_v8  ;;  %v1334_v8 = vld [vmem:[%s2145_s2 + $0x44] sm:$0xf] }
  0xb3   :  { %v1482_v37 = vmax.f32 %v169_v29, %v205_v32  ;;  %v1512_v4 = vmax.f32 %v179_v43, %v209_v56  ;;  %v1339_v32 = vld [vmem:[%s2145_s2 + $0x64] sm:$0xf0]  ;;  %v216_v43 = vmul.f32 0.01, %v196_v20 }
  0xb5   :  { %v188_v38 = vpop.f32.mrf.mxu2  ;;  %v259_v49 = vmul.f32 %v1482_v37, %v1482_v37  ;;  %v198_v53 = vpop.f32.mrf.mxu3  ;;  %v236_v55 = vadd.f32 %v235_v47, %v1482_v37  ;;  %v263_v24 = vmul.f32 %v1512_v4, %v1512_v4 }
  0xb6   :  { %v170_v40 = vpop.f32.mrf.mxu0  ;;  %v180_v41 = vpop.f32.mrf.mxu1  ;;  %v189_v5 = vadd.f32 %v1471_v22, %v188_v38 }
  0xb7   :  { %v171_v44 = vadd.f32 %v1471_v22, %v170_v40  ;;  %v181_v46 = vadd.f32 %v1471_v22, %v180_v41  ;;  %v274_v62 = vadd.f32 %v273_v54, %v259_v49  ;;  %v1233_v40 = vor.u32 %v1339_v32, %v1232_v31  ;;  %v1234_v41 = vld [vmem:[%s2145_s2 + $0x68] sm:$0xf0]  ;;  %v1336_v54 = vld [vmem:[%s2145_s2 + $0x54] sm:$0xf]  ;;  %v1210_v31 = vld [vmem:[%s2145_s2 + $0x38] sm:$0xf0] }
  0xb8   :  { %v213_v25 = vmul.f32 0.01, %v189_v5  ;;  %v1237_v45 = vor.u32 %v1338_v33, %v1234_v41  ;;  %v1330_v41 = vld [vmem:[%s2145_s2 + $0x24] sm:$0xf] }
  0xb9   :  { %v206_v50 = vmul.f32 0.01, %v171_v44  ;;  %v210_v60 = vmul.f32 0.01, %v181_v46  ;;  %450 = vmatpush.bf16.msrb.mxu1 %v1233_v40  ;;  %v1331_v40 = vld [vmem:[%s2145_s2 + $0x24] sm:$0xf0] }
  0xba   :  { %499 = vmatpush.bf16.msrb.mxu2 %v1237_v45 }
  0xbb   :  { %v1499_v57 = vmax.f32 %v171_v44, %v206_v50  ;;  %v1517_v10 = vmax.f32 %v181_v46, %v210_v60  ;;  %v199_v44 = vadd.f32 %v1471_v22, %v198_v53  ;;  %v1561_v46 = vmax.f32 %v189_v5, %v213_v25  ;;  %v1337_v53 = vld [vmem:[%s2145_s2 + $0x54] sm:$0xf0]  ;;  %v1226_v60 = vld [vmem:[%s2145_s2 + $0x58] sm:$0xf0]  ;;  %v1332_v25 = vld [vmem:[%s2145_s2 + $0x34] sm:$0xf] }
  0xbc   :  { %v266_v50 = vmul.f32 %v1541_v28, %v1541_v28  ;;  %v1225_v58 = vor.u32 %v1337_v53, %v1224_v52  ;;  %v1213_v32 = vor.u32 %v1332_v25, %v1210_v31  ;;  %v1192_v52 = vld [vmem:[%s2145_s2 + $0x10] sm:$0xf]  ;;  %v1329_v53 = vld [vmem:[%s2145_s2 + $0x14] sm:$0xf0] }
  0xbd   :  { %v237_v63 = vadd.f32 %v236_v55, %v1499_v57  ;;  %v260_v0 = vmul.f32 %v1499_v57, %v1499_v57  ;;  %v190_v3 = vpop.f32.mrf.mxu2  ;;  %v264_v29 = vmul.f32 %v1517_v10, %v1517_v10  ;;  %v200_v30 = vpop.f32.mrf.mxu3 }
  0xbe   :  { %v191_v15 = vadd.f32 %v1471_v22, %v190_v3  ;;  %v201_v49 = vadd.f32 %v1471_v22, %v200_v30  ;;  %451 = vmatpush.bf16.msrb.mxu1 %v1225_v58  ;;  %v1193_v58 = vor.u32 %v1329_v53, %v1192_v52 }
  0xbf   :  { %v238_v6 = vadd.f32 %v237_v63, %v1495_v51  ;;  %v275_v7 = vadd.f32 %v274_v62, %v260_v0  ;;  %v1583_v62 = vmax.f32 %v1503_v59, %v215_v9  ;;  %v217_v63 = vmul.f32 0.01, %v199_v44  ;;  %v1335_v59 = vld [vmem:[%s2145_s2 + $0x44] sm:$0xf0] }
  0xc0   :  { %v214_v39 = vmul.f32 0.01, %v191_v15  ;;  %v1229_v0 = vor.u32 %v1336_v54, %v1226_v60  ;;  %v218_v5 = vmul.f32 0.01, %v201_v49  ;;  %v1328_v54 = vld [vmem:[%s2145_s2 + $0x14] sm:$0xf] }
  0xc1   :  { %v276_v13 = vadd.f32 %v275_v7, %v261_v1  ;;  %v239_v14 = vadd.f32 %v238_v6, %v1505_v61  ;;  %v267_v1 = vmul.f32 %v1561_v46, %v1561_v46  ;;  %v1588_v6 = vmax.f32 %v196_v20, %v216_v43  ;;  %v1216_v7 = vld [vmem:[%s2145_s2 + $0x40] sm:$0xf]  ;;  %v1194_v60 = vld [vmem:[%s2145_s2 + $0x18] sm:$0xf0] }
  0xc2   :  { %v1576_v56 = vmax.f32 %v191_v15, %v214_v39  ;;  %500 = vmatpush.bf16.msrb.mxu2 %v1229_v0  ;;  %v269_v16 = vmul.f32 %v1583_v62, %v1583_v62  ;;  %v1608_v20 = vmax.f32 %v199_v44, %v217_v63  ;;  %v1200_v39 = vld [vmem:[%s2145_s2 + $0x20] sm:$0xf]  ;;  %v1197_v63 = vor.u32 %v1328_v54, %v1194_v60 }
  0xc3   :  { %v240_v26 = vadd.f32 %v239_v14, %v1512_v4  ;;  %v277_v27 = vadd.f32 %v276_v13, %v262_v12  ;;  %v1217_v13 = vor.u32 %v1335_v59, %v1216_v7  ;;  %v1218_v14 = vld [vmem:[%s2145_s2 + $0x48] sm:$0xf0]  ;;  %v270_v21 = vmul.f32 %v1588_v6, %v1588_v6 }
  0xc4   :  { %v268_v11 = vmul.f32 %v1576_v56, %v1576_v56  ;;  %v1221_v15 = vor.u32 %v1334_v8, %v1218_v14  ;;  %v1201_v45 = vor.u32 %v1331_v40, %v1200_v39 }
  0xc5   :  { %v241_v36 = vadd.f32 %v240_v26, %v1517_v10  ;;  %v278_v38 = vadd.f32 %v277_v27, %v263_v24  ;;  %452 = vmatpush.bf16.msrb.mxu1 %v1217_v13  ;;  %v1333_v24 = vld [vmem:[%s2145_s2 + $0x34] sm:$0xf0] }
  0xc6   :  { %501 = vmatpush.bf16.msrb.mxu2 %v1221_v15  ;;  %v1209_v30 = vor.u32 %v1333_v24, %v1208_v23 }
  0xc7   :  { %v242_v47 = vadd.f32 %v241_v36, %v1535_v19  ;;  %v279_v48 = vadd.f32 %v278_v38, %v264_v29  ;;  %v1622_v29 = vmax.f32 %v201_v49, %v218_v5  ;;  %v271_v36 = vmul.f32 %v1608_v20, %v1608_v20  ;;  %v1326_v5 = vld [vmem:[%s2145_s2 + $0x4] sm:$0xf] }
  0xc9   :  { %v280_v55 = vadd.f32 %v279_v48, %v265_v42  ;;  %v243_v22 = vadd.f32 %v242_v47, %v1541_v28  ;;  %453 = vmatpush.bf16.msrb.mxu1 %v1209_v30  ;;  %v272_v44 = vmul.f32 %v1622_v29, %v1622_v29  ;;  %v1202_v47 = vld [vmem:[%s2145_s2 + $0x28] sm:$0xf0] }
  0xca   :  { %502 = vmatpush.bf16.msrb.mxu2 %v1213_v32  ;;  %v1205_v48 = vor.u32 %v1330_v41, %v1202_v47 }
  0xcb   :  { %v244_v2 = vadd.f32 %v243_v22, %v1561_v46  ;;  %v281_v3 = vadd.f32 %v280_v55, %v266_v50 }
  0xcd   :  { %v245_v9 = vadd.f32 %v244_v2, %v1576_v56  ;;  %v282_v12 = vadd.f32 %v281_v3, %v267_v1  ;;  %454 = vmatpush.bf16.msrb.mxu1 %v1201_v45  ;;  %v1184_v2 = vld [vmem:[%s2145_s2] sm:$0xf]  ;;  %v1327_v3 = vld [vmem:[%s2145_s2 + $0x4] sm:$0xf0] }
  0xce   :  { %503 = vmatpush.bf16.msrb.mxu2 %v1205_v48  ;;  %v1185_v8 = vor.u32 %v1327_v3, %v1184_v2 }
  0xcf   :  { %v246_v17 = vadd.f32 %v245_v9, %v1583_v62  ;;  %v283_v18 = vadd.f32 %v282_v12, %v268_v11  ;;  %v1186_v9 = vld [vmem:[%s2145_s2 + $0x8] sm:$0xf0] }
  0xd0   :  { %v1189_v11 = vor.u32 %v1326_v5, %v1186_v9 }
  0xd1   :  { %v284_v26 = vadd.f32 %v283_v18, %v269_v16  ;;  %v247_v27 = vadd.f32 %v246_v17, %v1588_v6  ;;  %455 = vmatpush.bf16.msrb.mxu1 %v1193_v58 }
  0xd2   :  { %504 = vmatpush.bf16.msrb.mxu2 %v1197_v63 }
  0xd3   :  { %v248_v33 = vadd.f32 %v247_v27, %v1608_v20  ;;  %v285_v38 = vadd.f32 %v284_v26, %v270_v21 }
  0xd5   :  { %v286_v42 = vadd.f32 %v285_v38, %v271_v36  ;;  %v249_v43 = vadd.f32 %v248_v33, %v1622_v29  ;;  %456 = vmatpush.bf16.msrb.mxu1 %v1185_v8 }
  0xd6   :  { %505 = vmatpush.bf16.msrb.mxu2 %v1189_v11 }
  0xd7   :  { %v250_v49 = vrot.slane %v249_v43, 4  ;;  %v287_v50 = vadd.f32 %v286_v42, %v272_v44 }
  0xd9   :  { %v251_v55 = vadd.f32 %v250_v49, %v249_v43  ;;  %v288_v22 = vrot.slane %v287_v50, 4 }
  0xdb   :  { %v252_v0 = vrot.slane %v251_v55, 2  ;;  %v289_v1 = vadd.f32 %v288_v22, %v287_v50 }
  0xdd   :  { %v253_v7 = vadd.f32 %v252_v0, %v251_v55  ;;  %v290_v59 = vrot.slane %v289_v1, 2 }
  0xdf   :  { %v254_v12 = vrot.slane %v253_v7, 1  ;;  %v291_v13 = vadd.f32 %v290_v59, %v289_v1 }
  0xe1   :  { %v255_v14 = vadd.f32 %v254_v12, %v253_v7  ;;  %v292_v15 = vrot.slane %v291_v13, 1 }
  0xe3   :  { %v256_v16 = vmul.f32 0.0078125, %v255_v14  ;;  %v293_v17 = vadd.f32 %v292_v15, %v291_v13 }
  0xe5   :  { %v294_v18 = vmul.f32 0.0078125, %v293_v17  ;;  %v295_v21 = vmul.f32 %v256_v16, %v256_v16  ;;  %v303_v24 = vsub.f32 %v1512_v4, %v256_v16  ;;  %v304_v25 = vsub.f32 %v1517_v10, %v256_v16 }
  0xe6   :  { %v305_v26 = vsub.f32 %v1535_v19, %v256_v16  ;;  %v306_v27 = vsub.f32 %v1541_v28, %v256_v16  ;;  %v307_v30 = vsub.f32 %v1561_v46, %v256_v16  ;;  %v308_v31 = vsub.f32 %v1576_v56, %v256_v16 }
  0xe7   :  { %v296_v23 = vsub.f32 %v294_v18, %v295_v21  ;;  %v309_v32 = vsub.f32 %v1583_v62, %v256_v16  ;;  %v310_v36 = vsub.f32 %v1588_v6, %v256_v16  ;;  %v311_v38 = vsub.f32 %v1608_v20, %v256_v16 }
  0xe8   :  { %v312_v39 = vsub.f32 %v1622_v29, %v256_v16  ;;  %v297_v46 = vsub.f32 %v1479_v35, %v256_v16  ;;  %v298_v56 = vsub.f32 %v1477_v34, %v256_v16  ;;  %v299_v62 = vsub.f32 %v1482_v37, %v256_v16 }
  0xe9   :  { %v313_v33 = vadd.f32 1e-05, %v296_v23  ;;  %v300_v6 = vsub.f32 %v1499_v57, %v256_v16  ;;  %v301_v0 = vsub.f32 %v1495_v51, %v256_v16  ;;  %v302_v1 = vsub.f32 %v1505_v61, %v256_v16 }
  0xeb   :  { %1384 = vrsqrt.f32 %v313_v33  ;;  %vm320_vm1 = vweird.f32 %v313_v33 }
  0xf1   :  { %v1385_v4 = vpop.eup %1384 }
  0xf2   :  { %v315_v10 = vmul.f32 %v1385_v4, %v313_v33  ;;  %vm321_vm0 = vweird.f32 %v1385_v4 }
  0xf3   :  { %vm322_vm2 = vmor %vm320_vm1, %vm321_vm0 }
  0xf4   :  { %v316_v40 = vmul.f32 %v1385_v4, %v315_v10 }
  0xf6   :  { %v317_v19 = vmul.f32 0.5, %v316_v40 }
  0xf8   :  { %v318_v41 = vsub.f32 1.5, %v317_v19 }
  0xfa   :  { %v319_v28 = vmul.f32 %v1385_v4, %v318_v41 }
  0xfc   :  { %v323_v20 = vsel %vm322_vm2, %v1385_v4, %v319_v28 }
  0xfd   :  { %v324_v29 = vmul.f32 %v323_v20, %v297_v46  ;;  %v325_v42 = vmul.f32 %v323_v20, %v298_v56  ;;  %v326_v43 = vmul.f32 %v323_v20, %v299_v62  ;;  %v327_v44 = vmul.f32 %v323_v20, %v300_v6 }
  0xfe   :  { %v330_v45 = vmul.f32 %v323_v20, %v303_v24  ;;  %v331_v47 = vmul.f32 %v323_v20, %v304_v25  ;;  %v332_v50 = vmul.f32 %v323_v20, %v305_v26  ;;  %v333_v52 = vmul.f32 %v323_v20, %v306_v27  ;;  %v21_v26 = vld [vmem:[%s2143_s4 + $0x1] sm:$0x3] }
  0xff   :  { %v340_v48 = vpack.c.bf16 %v325_v42, %v324_v29  ;;  %v341_v49 = vpack.c.bf16 %v327_v44, %v326_v43  ;;  %v334_v54 = vmul.f32 %v323_v20, %v307_v30  ;;  %v335_v35 = vmul.f32 %v323_v20, %v308_v31 }
 0x100   :  { %v343_v53 = vpack.c.bf16 %v331_v47, %v330_v45  ;;  %v344_v34 = vpack.c.bf16 %v333_v52, %v332_v50  ;;  %v336_v37 = vmul.f32 %v323_v20, %v309_v32  ;;  %v337_v55 = vmul.f32 %v323_v20, %v310_v36 }
 0x101   :  { %457 = vmatmul.bf16.vlgmr.msrb.gmra.mxu1 %v340_v48  ;;  %506 = vmatmul.bf16.vlgmr.msrb.gmra.mxu2 %v340_v48  ;;  %v345_v57 = vpack.c.bf16 %v335_v35, %v334_v54  ;;  %v338_v22 = vmul.f32 %v323_v20, %v311_v38  ;;  %v339_v58 = vmul.f32 %v323_v20, %v312_v39  ;;  %v1696_v30 = vperm.slane %v21_v26, 0 }
 0x102   :  { %v346_v60 = vpack.c.bf16 %v337_v55, %v336_v37  ;;  %v328_v2 = vmul.f32 %v323_v20, %v301_v0  ;;  %v329_v3 = vmul.f32 %v323_v20, %v302_v1  ;;  %v1698_v31 = vperm.slane %v21_v26, 1 }
 0x103   :  { %v347_v63 = vpack.c.bf16 %v339_v58, %v338_v22 }
 0x104   :  { %v342_v5 = vpack.c.bf16 %v329_v3, %v328_v2 }
 0x111   :  { %462 = vmatmul.bf16.gmra.mxu1 %v341_v49  ;;  %511 = vmatmul.bf16.gmra.mxu2 %v341_v49 }
 0x121   :  { %467 = vmatmul.bf16.gmra.mxu1 %v342_v5  ;;  %516 = vmatmul.bf16.gmra.mxu2 %v342_v5 }
 0x131   :  { %472 = vmatmul.bf16.gmra.mxu1 %v343_v53  ;;  %521 = vmatmul.bf16.gmra.mxu2 %v343_v53 }
 0x141   :  { %477 = vmatmul.bf16.gmra.mxu1 %v344_v34  ;;  %526 = vmatmul.bf16.gmra.mxu2 %v344_v34 }
 0x151   :  { %482 = vmatmul.bf16.gmra.mxu1 %v345_v57  ;;  %531 = vmatmul.bf16.gmra.mxu2 %v345_v57 }
 0x161   :  { %487 = vmatmul.bf16.gmra.mxu1 %v346_v60  ;;  %536 = vmatmul.bf16.gmra.mxu2 %v346_v60 }
 0x171   :  { %492 = vmatmul.bf16.gmra.mxu1 %v347_v63  ;;  %541 = vmatmul.bf16.gmra.mxu2 %v347_v63 }
 0x17e   :  { %v458_v7 = vpop.f32.mrf.mxu1 }
 0x17f   :  { %v459_v33 = vadd.f32 %v458_v7, %v1696_v30 }
 0x181   :  { %v547_v41 = vmul.f32 0.01, %v459_v33 }
 0x183   :  { %v1714_v42 = vmax.f32 %v459_v33, %v547_v41 }
 0x184   :  { %v507_v59 = vpop.f32.mrf.mxu2 }
 0x185   :  { %v508_v38 = vadd.f32 %v507_v59, %v1698_v31  ;;  %v655_v55 = vmul.f32 %v1714_v42, %v1714_v42 }
 0x186   :  { %v460_v51 = vpop.f32.mrf.mxu1 }
 0x187   :  { %v461_v32 = vadd.f32 %v460_v51, %v1696_v30  ;;  %v548_v46 = vmul.f32 0.01, %v508_v38 }
 0x189   :  { %v549_v40 = vmul.f32 0.01, %v461_v32  ;;  %v1719_v47 = vmax.f32 %v508_v38, %v548_v46 }
 0x18b   :  { %v1712_v20 = vmax.f32 %v461_v32, %v549_v40  ;;  %v656_v58 = vmul.f32 %v1719_v47, %v1719_v47 }
 0x18c   :  { %v509_v8 = vpop.f32.mrf.mxu2 }
 0x18d   :  { %v510_v39 = vadd.f32 %v509_v8, %v1698_v31  ;;  %v657_v35 = vmul.f32 %v1712_v20, %v1712_v20  ;;  %v611_v7 = vadd.f32 %v1712_v20, %v1714_v42 }
 0x18e   :  { %v463_v61 = vpop.f32.mrf.mxu1 }
 0x18f   :  { %v464_v4 = vadd.f32 %v463_v61, %v1696_v30  ;;  %v550_v56 = vmul.f32 0.01, %v510_v39  ;;  %v687_v59 = vadd.f32 %v657_v35, %v655_v55 }
 0x191   :  { %v551_v62 = vmul.f32 0.01, %v464_v4  ;;  %v1721_v48 = vmax.f32 %v510_v39, %v550_v56 }
 0x193   :  { %v1724_v50 = vmax.f32 %v464_v4, %v551_v62  ;;  %v658_v60 = vmul.f32 %v1721_v48, %v1721_v48  ;;  %v632_v61 = vadd.f32 %v1721_v48, %v1719_v47 }
 0x194   :  { %v512_v9 = vpop.f32.mrf.mxu2 }
 0x195   :  { %v513_v19 = vadd.f32 %v512_v9, %v1698_v31  ;;  %v659_v1 = vmul.f32 %v1724_v50, %v1724_v50 }
 0x196   :  { %v465_v11 = vpop.f32.mrf.mxu1 }
 0x197   :  { %v466_v28 = vadd.f32 %v465_v11, %v1696_v30  ;;  %v552_v29 = vmul.f32 0.01, %v513_v19 }
 0x199   :  { %v553_v43 = vmul.f32 0.01, %v466_v28  ;;  %v1731_v34 = vmax.f32 %v513_v19, %v552_v29 }
 0x19b   :  { %v1736_v57 = vmax.f32 %v466_v28, %v553_v43  ;;  %v660_v51 = vmul.f32 %v1731_v34, %v1731_v34  ;;  %v633_v39 = vadd.f32 %v632_v61, %v1731_v34 }
 0x19c   :  { %v514_v12 = vpop.f32.mrf.mxu2 }
 0x19d   :  { %v515_v6 = vadd.f32 %v514_v12, %v1698_v31  ;;  %v661_v9 = vmul.f32 %v1736_v57, %v1736_v57 }
 0x19e   :  { %v468_v13 = vpop.f32.mrf.mxu1 }
 0x19f   :  { %v469_v44 = vadd.f32 %v468_v13, %v1696_v30  ;;  %v554_v52 = vmul.f32 0.01, %v515_v6 }
 0x1a1   :  { %v555_v22 = vmul.f32 0.01, %v469_v44  ;;  %v1745_v2 = vmax.f32 %v515_v6, %v554_v52 }
 0x1a3   :  { %v1756_v11 = vmax.f32 %v469_v44, %v555_v22  ;;  %v662_v26 = vmul.f32 %v1745_v2, %v1745_v2  ;;  %v634_v56 = vadd.f32 %v633_v39, %v1745_v2 }
 0x1a4   :  { %v517_v14 = vpop.f32.mrf.mxu2 }
 0x1a5   :  { %v518_v49 = vadd.f32 %v517_v14, %v1698_v31  ;;  %v708_v14 = vadd.f32 %v658_v60, %v656_v58  ;;  %v663_v28 = vmul.f32 %v1756_v11, %v1756_v11 }
 0x1a6   :  { %v470_v15 = vpop.f32.mrf.mxu1 }
 0x1a7   :  { %v471_v53 = vadd.f32 %v470_v15, %v1696_v30  ;;  %v556_v63 = vmul.f32 0.01, %v518_v49  ;;  %v612_v15 = vadd.f32 %v611_v7, %v1724_v50  ;;  %v709_v4 = vadd.f32 %v708_v14, %v660_v51 }
 0x1a9   :  { %v557_v3 = vmul.f32 0.01, %v471_v53  ;;  %v613_v19 = vadd.f32 %v612_v15, %v1736_v57  ;;  %v710_v43 = vadd.f32 %v709_v4, %v662_v26 }
 0x1ab   :  { %v1766_v32 = vmax.f32 %v471_v53, %v557_v3  ;;  %v614_v52 = vadd.f32 %v613_v19, %v1756_v11 }
 0x1ac   :  { %v519_v16 = vpop.f32.mrf.mxu2 }
 0x1ad   :  { %v520_v37 = vadd.f32 %v519_v16, %v1698_v31  ;;  %v1762_v16 = vmax.f32 %v518_v49, %v556_v63 }
 0x1ae   :  { %v473_v17 = vpop.f32.mrf.mxu1 }
 0x1af   :  { %v474_v0 = vadd.f32 %v473_v17, %v1696_v30  ;;  %v558_v8 = vmul.f32 0.01, %v520_v37  ;;  %v664_v62 = vmul.f32 %v1762_v16, %v1762_v16 }
 0x1b1   :  { %v559_v17 = vmul.f32 0.01, %v474_v0  ;;  %v711_v63 = vadd.f32 %v710_v43, %v664_v62 }
 0x1b3   :  { %v1779_v6 = vmax.f32 %v474_v0, %v559_v17 }
 0x1b4   :  { %v522_v18 = vpop.f32.mrf.mxu2 }
 0x1b5   :  { %v523_v5 = vadd.f32 %v522_v18, %v1698_v31  ;;  %v688_v18 = vadd.f32 %v687_v59, %v659_v1  ;;  %v667_v0 = vmul.f32 %v1779_v6, %v1779_v6 }
 0x1b6   :  { %v475_v21 = vpop.f32.mrf.mxu1 }
 0x1b7   :  { %v476_v12 = vadd.f32 %v475_v21, %v1696_v30  ;;  %v560_v33 = vmul.f32 0.01, %v523_v5  ;;  %v1769_v21 = vmax.f32 %v520_v37, %v558_v8  ;;  %v689_v41 = vadd.f32 %v688_v18, %v661_v9 }
 0x1b9   :  { %v561_v46 = vmul.f32 0.01, %v476_v12  ;;  %v1785_v44 = vmax.f32 %v523_v5, %v560_v33  ;;  %v666_v53 = vmul.f32 %v1769_v21, %v1769_v21  ;;  %v690_v55 = vadd.f32 %v689_v41, %v663_v28 }
 0x1bb   :  { %v1795_v22 = vmax.f32 %v476_v12, %v561_v46 }
 0x1bc   :  { %v1685_v23 = vpop.f32.mrf.mxu2 }
 0x1bd   :  { %v525_v29 = vadd.f32 %v1685_v23, %v1698_v31  ;;  %v635_v23 = vadd.f32 %v634_v56, %v1762_v16  ;;  %v669_v12 = vmul.f32 %v1795_v22, %v1795_v22 }
 0x1be   :  { %v1687_v24 = vpop.f32.mrf.mxu1 }
 0x1bf   :  { %v479_v40 = vadd.f32 %v1687_v24, %v1696_v30  ;;  %v665_v24 = vmul.f32 %v1766_v32, %v1766_v32  ;;  %v562_v1 = vmul.f32 0.01, %v525_v29  ;;  %v636_v51 = vadd.f32 %v635_v23, %v1769_v21 }
 0x1c1   :  { %v563_v35 = vmul.f32 0.01, %v479_v40  ;;  %v691_v3 = vadd.f32 %v690_v55, %v665_v24  ;;  %v637_v18 = vadd.f32 %v636_v51, %v1785_v44  ;;  %v1348_v51 = vld [vmem:[%s2146_s3 + $0x30] sm:$0xff] }
 0x1c3   :  { %v1807_v8 = vmax.f32 %v479_v40, %v563_v35  ;;  %v692_v17 = vadd.f32 %v691_v3, %v667_v0 }
 0x1c4   :  { %v1689_v25 = vpop.f32.mrf.mxu2 }
 0x1c5   :  { %v528_v37 = vadd.f32 %v1689_v25, %v1698_v31  ;;  %v668_v25 = vmul.f32 %v1785_v44, %v1785_v44  ;;  %v693_v46 = vadd.f32 %v692_v17, %v669_v12 }
 0x1c6   :  { %v1694_v27 = vpop.f32.mrf.mxu1 }
 0x1c7   :  { %v481_v49 = vadd.f32 %v1694_v27, %v1696_v30  ;;  %v615_v27 = vadd.f32 %v614_v52, %v1766_v32  ;;  %v564_v61 = vmul.f32 0.01, %v528_v37  ;;  %v1349_v52 = vld [vmem:[%s2146_s3 + $0x38] sm:$0xff] }
 0x1c8   :  { %968 = vmatpush.bf16.msrb.mxu3 %v1349_v52 }
 0x1c9   :  { %v565_v5 = vmul.f32 0.01, %v481_v49  ;;  %v616_v9 = vadd.f32 %v615_v27, %v1779_v6  ;;  %v1825_v41 = vmax.f32 %v528_v37, %v564_v61 }
 0x1cb   :  { %v1818_v39 = vmax.f32 %v481_v49, %v565_v5  ;;  %v617_v19 = vadd.f32 %v616_v9, %v1795_v22 }
 0x1cc   :  { %v1702_v36 = vpop.f32.mrf.mxu2  ;;  %969 = vmatpush.bf16.msrb.mxu3 %v1348_v51 }
 0x1cd   :  { %v530_v14 = vadd.f32 %v1702_v36, %v1698_v31  ;;  %v671_v36 = vmul.f32 %v1807_v8, %v1807_v8  ;;  %v618_v24 = vadd.f32 %v617_v19, %v1807_v8 }
 0x1ce   :  { %v1707_v10 = vpop.f32.mrf.mxu1 }
 0x1cf   :  { %v484_v58 = vadd.f32 %v1707_v10, %v1696_v30  ;;  %v712_v10 = vadd.f32 %v711_v63, %v666_v53  ;;  %v566_v56 = vmul.f32 0.01, %v530_v14  ;;  %v673_v53 = vmul.f32 %v1818_v39, %v1818_v39 }
 0x1d0   :  { %v694_v23 = vadd.f32 %v693_v46, %v671_v36 }
 0x1d1   :  { %v567_v15 = vmul.f32 0.01, %v484_v58  ;;  %v713_v33 = vadd.f32 %v712_v10, %v668_v25  ;;  %v1847_v0 = vmax.f32 %v530_v14, %v566_v56 }
 0x1d2   :  { %v695_v10 = vadd.f32 %v694_v23, %v673_v53 }
 0x1d3   :  { %v1828_v62 = vmax.f32 %v484_v58, %v567_v15  ;;  %v672_v58 = vmul.f32 %v1825_v41, %v1825_v41 }
 0x1d4   :  { %v1717_v45 = vpop.f32.mrf.mxu2 }
 0x1d5   :  { %v533_v4 = vadd.f32 %v1717_v45, %v1698_v31 }
 0x1d6   :  { %v1727_v54 = vpop.f32.mrf.mxu1 }
 0x1d7   :  { %v486_v7 = vadd.f32 %v1727_v54, %v1696_v30  ;;  %v1815_v54 = vmax.f32 %v525_v29, %v562_v1  ;;  %v568_v35 = vmul.f32 0.01, %v533_v4  ;;  %v675_v1 = vmul.f32 %v1828_v62, %v1828_v62 }
 0x1d9   :  { %v569_v40 = vmul.f32 0.01, %v486_v7  ;;  %v638_v45 = vadd.f32 %v637_v18, %v1815_v54  ;;  %v670_v43 = vmul.f32 %v1815_v54, %v1815_v54  ;;  %v1858_v61 = vmax.f32 %v533_v4, %v568_v35 }
 0x1da   :  { %v696_v4 = vadd.f32 %v695_v10, %v675_v1 }
 0x1db   :  { %v1841_v37 = vmax.f32 %v486_v7, %v569_v40  ;;  %v714_v5 = vadd.f32 %v713_v33, %v670_v43  ;;  %v639_v14 = vadd.f32 %v638_v45, %v1825_v41  ;;  %v674_v33 = vmul.f32 %v1847_v0, %v1847_v0  ;;  %v1347_v45 = vld [vmem:[%s2146_s3 + $0x28] sm:$0xff] }
 0x1dc   :  { %v1759_v13 = vpop.f32.mrf.mxu2  ;;  %970 = vmatpush.bf16.msrb.mxu3 %v1347_v45  ;;  %v1345_v45 = vld [vmem:[%s2146_s3 + $0x18] sm:$0xff] }
 0x1dd   :  { %v677_v9 = vmul.f32 %v1841_v37, %v1841_v37  ;;  %v715_v15 = vadd.f32 %v714_v5, %v672_v58  ;;  %v640_v43 = vadd.f32 %v639_v14, %v1847_v0  ;;  %v1356_v58 = vld [vmem:[%s2146_s3 + $0x70] sm:$0xff] }
 0x1de   :  { %v488_v38 = vpop.f32.mrf.mxu1 }
 0x1df   :  { %v489_v26 = vadd.f32 %v488_v38, %v1696_v30  ;;  %v535_v38 = vadd.f32 %v1759_v13, %v1698_v31 }
 0x1e1   :  { %v571_v49 = vmul.f32 0.01, %v489_v26  ;;  %v570_v3 = vmul.f32 0.01, %v535_v38 }
 0x1e3   :  { %v1853_v7 = vmax.f32 %v489_v26, %v571_v49  ;;  %v1357_v26 = vld [vmem:[%s2146_s3 + $0x78] sm:$0xff]  ;;  %v1871_v40 = vmax.f32 %v535_v38, %v570_v3  ;;  %v676_v38 = vmul.f32 %v1858_v61, %v1858_v61 }
 0x1e4   :  { %v537_v60 = vpop.f32.mrf.mxu2  ;;  %1017 = vmatpush.bf16.msrb.mxu0 %v1357_v26 }
 0x1e5   :  { %v538_v13 = vadd.f32 %v537_v60, %v1698_v31  ;;  %v619_v60 = vadd.f32 %v618_v24, %v1818_v39  ;;  %v679_v56 = vmul.f32 %v1853_v7, %v1853_v7  ;;  %v697_v24 = vadd.f32 %v696_v4, %v677_v9 }
 0x1e6   :  { %v490_v59 = vpop.f32.mrf.mxu1 }
 0x1e7   :  { %v491_v28 = vadd.f32 %v490_v59, %v1696_v30  ;;  %v572_v12 = vmul.f32 0.01, %v538_v13  ;;  %v620_v17 = vadd.f32 %v619_v60, %v1828_v62  ;;  %v698_v3 = vadd.f32 %v697_v24, %v679_v56 }
 0x1e8   :  { %1018 = vmatpush.bf16.msrb.mxu0 %v1356_v58 }
 0x1e9   :  { %v573_v63 = vmul.f32 0.01, %v491_v28  ;;  %v621_v46 = vadd.f32 %v620_v17, %v1841_v37  ;;  %v1885_v49 = vmax.f32 %v538_v13, %v572_v12  ;;  %v678_v13 = vmul.f32 %v1871_v40, %v1871_v40  ;;  %v1355_v17 = vld [vmem:[%s2146_s3 + $0x68] sm:$0xff] }
 0x1eb   :  { %v1864_v18 = vmax.f32 %v491_v28, %v573_v63  ;;  %v622_v53 = vadd.f32 %v621_v46, %v1853_v7  ;;  %v716_v63 = vadd.f32 %v715_v15, %v674_v33  ;;  %v680_v9 = vmul.f32 %v1885_v49, %v1885_v49 }
 0x1ec   :  { %v539_v29 = vpop.f32.mrf.mxu2  ;;  %1019 = vmatpush.bf16.msrb.mxu0 %v1355_v17  ;;  %v1343_v17 = vld [vmem:[%s2146_s3 + $0x8] sm:$0xff] }
 0x1ed   :  { %v540_v25 = vadd.f32 %v539_v29, %v1698_v31  ;;  %v681_v35 = vmul.f32 %v1864_v18, %v1864_v18  ;;  %v623_v5 = vadd.f32 %v622_v53, %v1864_v18  ;;  %v717_v51 = vadd.f32 %v716_v63, %v676_v38 }
 0x1ee   :  { %v493_v55 = vpop.f32.mrf.mxu1 }
 0x1ef   :  { %v494_v27 = vadd.f32 %v493_v55, %v1696_v30  ;;  %v574_v19 = vmul.f32 0.01, %v540_v25  ;;  %v699_v12 = vadd.f32 %v698_v3, %v681_v35  ;;  %v718_v26 = vadd.f32 %v717_v51, %v678_v13  ;;  %v1344_v13 = vld [vmem:[%s2146_s3 + $0x10] sm:$0xff]  ;;  %v1353_v51 = vld [vmem:[%s2146_s3 + $0x58] sm:$0xff] }
 0x1f1   :  { %v575_v59 = vmul.f32 0.01, %v494_v27  ;;  %v1897_v1 = vmax.f32 %v540_v25, %v574_v19 }
 0x1f3   :  { %v1876_v28 = vmax.f32 %v494_v27, %v575_v59  ;;  %v641_v27 = vadd.f32 %v640_v43, %v1858_v61  ;;  %v1346_v59 = vld [vmem:[%s2146_s3 + $0x20] sm:$0xff]  ;;  %v682_v4 = vmul.f32 %v1897_v1, %v1897_v1  ;;  %v719_v43 = vadd.f32 %v718_v26, %v680_v9 }
 0x1f4   :  { %v542_v36 = vpop.f32.mrf.mxu2  ;;  %971 = vmatpush.bf16.msrb.mxu3 %v1346_v59 }
 0x1f5   :  { %v543_v29 = vadd.f32 %v542_v36, %v1698_v31  ;;  %v683_v60 = vmul.f32 %v1876_v28, %v1876_v28  ;;  %v642_v10 = vadd.f32 %v641_v27, %v1871_v40  ;;  %v624_v14 = vadd.f32 %v623_v5, %v1876_v28 }
 0x1f6   :  { %v495_v52 = vpop.f32.mrf.mxu1 }
 0x1f7   :  { %v576_v55 = vmul.f32 0.01, %v543_v29  ;;  %v496_v23 = vadd.f32 %v495_v52, %v1696_v30  ;;  %v643_v33 = vadd.f32 %v642_v10, %v1885_v49  ;;  %v700_v36 = vadd.f32 %v699_v12, %v683_v60 }
 0x1f8   :  { %972 = vmatpush.bf16.msrb.mxu3 %v1345_v45 }
 0x1f9   :  { %v577_v30 = vmul.f32 0.01, %v496_v23  ;;  %v1908_v25 = vmax.f32 %v543_v29, %v576_v55  ;;  %v644_v24 = vadd.f32 %v643_v33, %v1897_v1  ;;  %v1354_v55 = vld [vmem:[%s2146_s3 + $0x60] sm:$0xff] }
 0x1fa   :  { %1020 = vmatpush.bf16.msrb.mxu0 %v1354_v55 }
 0x1fb   :  { %v1911_v15 = vmax.f32 %v496_v23, %v577_v30  ;;  %v684_v38 = vmul.f32 %v1908_v25, %v1908_v25  ;;  %v645_v23 = vadd.f32 %v644_v24, %v1908_v25 }
 0x1fc   :  { %v544_v19 = vpop.f32.mrf.mxu2  ;;  %973 = vmatpush.bf16.msrb.mxu3 %v1344_v13 }
 0x1fd   :  { %v625_v46 = vadd.f32 %v624_v14, %v1911_v15  ;;  %v685_v56 = vmul.f32 %v1911_v15, %v1911_v15  ;;  %v545_v29 = vadd.f32 %v544_v19, %v1698_v31  ;;  %v720_v31 = vadd.f32 %v719_v43, %v682_v4  ;;  %v1342_v43 = vld [vmem:[%s2146_s3] sm:$0xff] }
 0x1fe   :  { %1021 = vmatpush.bf16.msrb.mxu0 %v1353_v51 }
 0x1ff   :  { %v626_v52 = vrot.slane %v625_v46, 4  ;;  %v701_v53 = vadd.f32 %v700_v36, %v685_v56  ;;  %v578_v35 = vmul.f32 0.01, %v545_v29  ;;  %v721_v3 = vadd.f32 %v720_v31, %v684_v38  ;;  %v1352_v36 = vld [vmem:[%s2146_s3 + $0x50] sm:$0xff]  ;;  %v1351_v38 = vld [vmem:[%s2146_s3 + $0x48] sm:$0xff] }
 0x200   :  { %974 = vmatpush.bf16.msrb.mxu3 %v1343_v17 }
 0x201   :  { %v627_v58 = vadd.f32 %v626_v52, %v625_v46  ;;  %v702_v63 = vrot.slane %v701_v53, 4  ;;  %v1933_v27 = vmax.f32 %v545_v29, %v578_v35 }
 0x202   :  { %1022 = vmatpush.bf16.msrb.mxu0 %v1352_v36 }
 0x203   :  { %v628_v5 = vrot.slane %v627_v58, 2  ;;  %v703_v60 = vadd.f32 %v702_v63, %v701_v53  ;;  %v646_v30 = vadd.f32 %v645_v23, %v1933_v27  ;;  %v686_v59 = vmul.f32 %v1933_v27, %v1933_v27  ;;  %v1350_v63 = vld [vmem:[%s2146_s3 + $0x40] sm:$0xff] }
 0x204   :  { %975 = vmatpush.bf16.msrb.mxu3 %v1342_v43 }
 0x205   :  { %v629_v10 = vadd.f32 %v628_v5, %v627_v58  ;;  %v704_v9 = vrot.slane %v703_v60, 2  ;;  %v647_v12 = vrot.slane %v646_v30, 4  ;;  %v722_v14 = vadd.f32 %v721_v3, %v686_v59 }
 0x206   :  { %1023 = vmatpush.bf16.msrb.mxu0 %v1351_v38 }
 0x207   :  { %v630_v26 = vrot.slane %v629_v10, 1  ;;  %v705_v33 = vadd.f32 %v704_v9, %v703_v60  ;;  %v648_v4 = vadd.f32 %v647_v12, %v646_v30  ;;  %v723_v19 = vrot.slane %v722_v14, 4 }
 0x209   :  { %v631_v46 = vadd.f32 %v630_v26, %v629_v10  ;;  %v706_v56 = vrot.slane %v705_v33, 1  ;;  %v649_v29 = vrot.slane %v648_v4, 2  ;;  %v724_v45 = vadd.f32 %v723_v19, %v722_v14 }
 0x20a   :  { %1024 = vmatpush.bf16.msrb.mxu0 %v1350_v63 }
 0x20b   :  { %v1956_v24 = vmul.f32 0.0078125, %v631_v46  ;;  %v707_v52 = vadd.f32 %v706_v56, %v705_v33  ;;  %v650_v53 = vadd.f32 %v649_v29, %v648_v4  ;;  %v725_v35 = vrot.slane %v724_v45, 2 }
 0x20d   :  { %v729_v55 = vmul.f32 0.0078125, %v707_v52  ;;  %v731_v31 = vmul.f32 %v1956_v24, %v1956_v24  ;;  %v651_v23 = vrot.slane %v650_v53, 1  ;;  %v726_v58 = vadd.f32 %v725_v35, %v724_v45 }
 0x20e   :  { %v755_v51 = vsub.f32 %v1828_v62, %v1956_v24  ;;  %v757_v10 = vsub.f32 %v1841_v37, %v1956_v24  ;;  %v759_v9 = vsub.f32 %v1853_v7, %v1956_v24  ;;  %v761_v12 = vsub.f32 %v1864_v18, %v1956_v24 }
 0x20f   :  { %v733_v13 = vsub.f32 %v729_v55, %v731_v31  ;;  %v652_v3 = vadd.f32 %v651_v23, %v650_v53  ;;  %v727_v5 = vrot.slane %v726_v58, 1  ;;  %v763_v18 = vsub.f32 %v1876_v28, %v1956_v24 }
 0x210   :  { %v765_v19 = vsub.f32 %v1911_v15, %v1956_v24  ;;  %v735_v15 = vsub.f32 %v1714_v42, %v1956_v24  ;;  %v751_v35 = vsub.f32 %v1807_v8, %v1956_v24  ;;  %v753_v31 = vsub.f32 %v1818_v39, %v1956_v24 }
 0x211   :  { %v767_v60 = vadd.f32 1e-05, %v733_v13  ;;  %v1963_v30 = vmul.f32 0.0078125, %v652_v3  ;;  %v728_v59 = vadd.f32 %v727_v5, %v726_v58 }
 0x213   :  { %1386 = vrsqrt.f32 %v767_v60  ;;  %v730_v14 = vmul.f32 0.0078125, %v728_v59  ;;  %v732_v17 = vmul.f32 %v1963_v30, %v1963_v30  ;;  %v756_v33 = vsub.f32 %v1858_v61, %v1963_v30 }
 0x214   :  { %v758_v62 = vsub.f32 %v1871_v40, %v1963_v30  ;;  %v760_v37 = vsub.f32 %v1885_v49, %v1963_v30  ;;  %v762_v7 = vsub.f32 %v1897_v1, %v1963_v30  ;;  %v764_v36 = vsub.f32 %v1908_v25, %v1963_v30 }
 0x215   :  { %v734_v26 = vsub.f32 %v730_v14, %v732_v17  ;;  %v766_v61 = vsub.f32 %v1933_v27, %v1963_v30  ;;  %vm775_vm4 = vweird.f32 %v767_v60  ;;  %v737_v25 = vsub.f32 %v1712_v20, %v1956_v24 }
 0x216   :  { %v736_v42 = vsub.f32 %v1719_v47, %v1963_v30  ;;  %v738_v8 = vsub.f32 %v1721_v48, %v1963_v30 }
 0x217   :  { %v768_v4 = vadd.f32 1e-05, %v734_v26 }
 0x219   :  { %v1387_v46 = vpop.eup %1386  ;;  %1388 = vrsqrt.f32 %v768_v4  ;;  %vm785_vm7 = vweird.f32 %v768_v4 }
 0x21a   :  { %v770_v40 = vmul.f32 %v1387_v46, %v767_v60  ;;  %vm776_vm3 = vweird.f32 %v1387_v46 }
 0x21b   :  { %vm777_vm5 = vmor %vm775_vm4, %vm776_vm3 }
 0x21c   :  { %v771_v56 = vmul.f32 %v1387_v46, %v770_v40 }
 0x21e   :  { %v772_v49 = vmul.f32 0.5, %v771_v56 }
 0x21f   :  { %v1389_v29 = vpop.eup %1388 }
 0x220   :  { %v773_v45 = vsub.f32 1.5, %v772_v49  ;;  %v780_v1 = vmul.f32 %v1389_v29, %v768_v4  ;;  %vm786_vm6 = vweird.f32 %v1389_v29 }
 0x221   :  { %vm787_vm8 = vmor %vm785_vm7, %vm786_vm6 }
 0x222   :  { %v774_v43 = vmul.f32 %v1387_v46, %v773_v45  ;;  %v781_v28 = vmul.f32 %v1389_v29, %v780_v1  ;;  %v739_v45 = vsub.f32 %v1724_v50, %v1956_v24  ;;  %v741_v1 = vsub.f32 %v1736_v57, %v1956_v24 }
 0x223   :  { %v743_v57 = vsub.f32 %v1756_v11, %v1956_v24  ;;  %v747_v11 = vsub.f32 %v1779_v6, %v1956_v24  ;;  %v2076_v6 = vld [vmem:[%s2143_s4 + $0x3] ss:$0 sm:$0xff] }
 0x224   :  { %v1995_v27 = vsel %vm777_vm5, %v1387_v46, %v774_v43  ;;  %v782_v38 = vmul.f32 0.5, %v781_v28 }
 0x225   :  { %v789_v52 = vmul.f32 %v1995_v27, %v735_v15  ;;  %v791_v53 = vmul.f32 %v1995_v27, %v737_v25  ;;  %v2006_v20 = vmul.f32 %v1995_v27, %v751_v35  ;;  %v2009_v63 = vmul.f32 %v1995_v27, %v753_v31 }
 0x226   :  { %v783_v55 = vsub.f32 1.5, %v782_v38  ;;  %v2012_v13 = vmul.f32 %v1995_v27, %v755_v51  ;;  %v2017_v39 = vmul.f32 %v1995_v27, %v757_v10  ;;  %v2020_v47 = vmul.f32 %v1995_v27, %v759_v9 }
 0x227   :  { %v821_v23 = vpack.c.bf16 %v791_v53, %v789_v52  ;;  %v2023_v3 = vmul.f32 %v1995_v27, %v761_v12  ;;  %v829_v60 = vpack.c.bf16 %v2009_v63, %v2006_v20  ;;  %v2028_v59 = vmul.f32 %v1995_v27, %v763_v18 }
 0x228   :  { %v784_v58 = vmul.f32 %v1389_v29, %v783_v55  ;;  %v2031_v51 = vmul.f32 %v1995_v27, %v765_v19  ;;  %v752_v10 = vsub.f32 %v1825_v41, %v1963_v30  ;;  %v754_v9 = vsub.f32 %v1847_v0, %v1963_v30 }
 0x229   :  { %976 = vmatmul.bf16.vlgmr.msrb.gmra.mxu3 %v821_v23  ;;  %v831_v4 = vpack.c.bf16 %v2017_v39, %v2012_v13  ;;  %v833_v19 = vpack.c.bf16 %v2023_v3, %v2020_v47  ;;  %v795_v15 = vmul.f32 %v1995_v27, %v741_v1  ;;  %v745_v38 = vsub.f32 %v1766_v32, %v1956_v24 }
 0x22a   :  { %v788_v5 = vsel %vm787_vm8, %v1389_v29, %v784_v58  ;;  %v835_v41 = vpack.c.bf16 %v2031_v51, %v2028_v59  ;;  %v797_v52 = vmul.f32 %v1995_v27, %v743_v57  ;;  %v749_v32 = vsub.f32 %v1795_v22, %v1956_v24 }
 0x22b   :  { %v790_v48 = vmul.f32 %v788_v5, %v736_v42  ;;  %v792_v14 = vmul.f32 %v788_v5, %v738_v8  ;;  %v806_v17 = vmul.f32 %v788_v5, %v752_v10  ;;  %v808_v26 = vmul.f32 %v788_v5, %v754_v9 }
 0x22c   :  { %v810_v46 = vmul.f32 %v788_v5, %v756_v33  ;;  %v812_v40 = vmul.f32 %v788_v5, %v758_v62  ;;  %v814_v56 = vmul.f32 %v788_v5, %v760_v37  ;;  %v816_v49 = vmul.f32 %v788_v5, %v762_v7 }
 0x22d   :  { %v822_v12 = vpack.c.bf16 %v792_v14, %v790_v48  ;;  %v830_v18 = vpack.c.bf16 %v808_v26, %v806_v17  ;;  %v818_v29 = vmul.f32 %v788_v5, %v764_v36  ;;  %v820_v0 = vmul.f32 %v788_v5, %v766_v61 }
 0x22e   :  { %v832_v33 = vpack.c.bf16 %v812_v40, %v810_v46  ;;  %v834_v43 = vpack.c.bf16 %v816_v49, %v814_v56  ;;  %v793_v62 = vmul.f32 %v1995_v27, %v739_v45  ;;  %v740_v7 = vsub.f32 %v1731_v34, %v1963_v30 }
 0x22f   :  { %1025 = vmatmul.bf16.vlgmr.msrb.gmra.mxu0 %v822_v12  ;;  %v836_v28 = vpack.c.bf16 %v820_v0, %v818_v29  ;;  %v742_v36 = vsub.f32 %v1745_v2, %v1963_v30  ;;  %v799_v53 = vmul.f32 %v1995_v27, %v745_v38  ;;  %v744_v34 = vsub.f32 %v1762_v16, %v1963_v30 }
 0x230   :  { %v823_v37 = vpack.c.bf16 %v795_v15, %v793_v62  ;;  %v794_v61 = vmul.f32 %v788_v5, %v740_v7  ;;  %v746_v2 = vsub.f32 %v1769_v21, %v1963_v30  ;;  %v801_v42 = vmul.f32 %v1995_v27, %v747_v11 }
 0x231   :  { %v796_v50 = vmul.f32 %v788_v5, %v742_v36  ;;  %v825_v35 = vpack.c.bf16 %v799_v53, %v797_v52  ;;  %v798_v55 = vmul.f32 %v788_v5, %v744_v34  ;;  %v803_v20 = vmul.f32 %v1995_v27, %v749_v32 }
 0x232   :  { %v800_v31 = vmul.f32 %v788_v5, %v746_v2  ;;  %v748_v16 = vsub.f32 %v1785_v44, %v1963_v30  ;;  %v750_v21 = vsub.f32 %v1815_v54, %v1963_v30 }
 0x233   :  { %v824_v25 = vpack.c.bf16 %v796_v50, %v794_v61  ;;  %v827_v58 = vpack.c.bf16 %v803_v20, %v801_v42 }
 0x234   :  { %v826_v23 = vpack.c.bf16 %v800_v31, %v798_v55  ;;  %v802_v63 = vmul.f32 %v788_v5, %v748_v16  ;;  %v804_v13 = vmul.f32 %v788_v5, %v750_v21 }
 0x236   :  { %v828_v8 = vpack.c.bf16 %v804_v13, %v802_v63 }
 0x239   :  { %981 = vmatmul.bf16.gmra.mxu3 %v823_v37 }
 0x23f   :  { %1030 = vmatmul.bf16.gmra.mxu0 %v824_v25 }
 0x249   :  { %986 = vmatmul.bf16.gmra.mxu3 %v825_v35 }
 0x24f   :  { %1035 = vmatmul.bf16.gmra.mxu0 %v826_v23 }
 0x259   :  { %991 = vmatmul.bf16.gmra.mxu3 %v827_v58 }
 0x25f   :  { %1040 = vmatmul.bf16.gmra.mxu0 %v828_v8 }
 0x269   :  { %996 = vmatmul.bf16.gmra.mxu3 %v829_v60 }
 0x26f   :  { %1045 = vmatmul.bf16.gmra.mxu0 %v830_v18 }
 0x279   :  { %1001 = vmatmul.bf16.gmra.mxu3 %v831_v4 }
 0x27f   :  { %1050 = vmatmul.bf16.gmra.mxu0 %v832_v33 }
 0x289   :  { %1006 = vmatmul.bf16.gmra.mxu3 %v833_v19 }
 0x28f   :  { %1055 = vmatmul.bf16.gmra.mxu0 %v834_v43 }
 0x299   :  { %1011 = vmatmul.bf16.gmra.mxu3 %v835_v41 }
 0x29f   :  { %1060 = vmatmul.bf16.gmra.mxu0 %v836_v28 }
 0x2ac   :  { %v977_v44 = vpop.f32.mrf.mxu3  ;;  %v1026_v22 = vpop.f32.mrf.mxu0 }
 0x2ad   :  { %v978_v54 = vadd.f32 %v2076_v6, %v977_v44 }
 0x2af   :  { %v1027_v24 = vadd.f32 %v1026_v22, %v978_v54 }
 0x2b1   :  { %v1066_v30 = vmul.f32 0.01, %v1027_v24 }
 0x2b3   :  { %v1082_v27 = vmax.f32 %v1027_v24, %v1066_v30 }
 0x2b4   :  { %v979_v39 = vpop.f32.mrf.mxu3  ;;  %v1028_v47 = vpop.f32.mrf.mxu0 }
 0x2b5   :  { %1098 = vst [vmem:[%s2147_s5] sm:$0xff] %v1082_v27  ;;  %v980_v3 = vadd.f32 %v2076_v6, %v979_v39 }
 0x2b7   :  { %v1029_v5 = vadd.f32 %v1028_v47, %v980_v3 }
 0x2b9   :  { %v1067_v60 = vmul.f32 0.01, %v1029_v5 }
 0x2bb   :  { %v1083_v59 = vmax.f32 %v1029_v5, %v1067_v60 }
 0x2bc   :  { %v982_v51 = vpop.f32.mrf.mxu3  ;;  %v1031_v48 = vpop.f32.mrf.mxu0 }
 0x2bd   :  { %1099 = vst [vmem:[%s2147_s5 + $0x8] sm:$0xff] %v1083_v59  ;;  %v983_v14 = vadd.f32 %v2076_v6, %v982_v51 }
 0x2bf   :  { %v1032_v10 = vadd.f32 %v1031_v48, %v983_v14 }
 0x2c1   :  { %v1068_v9 = vmul.f32 0.01, %v1032_v10 }
 0x2c3   :  { %v1084_v12 = vmax.f32 %v1032_v10, %v1068_v9 }
 0x2c4   :  { %v984_v17 = vpop.f32.mrf.mxu3  ;;  %v1033_v26 = vpop.f32.mrf.mxu0 }
 0x2c5   :  { %1100 = vst [vmem:[%s2147_s5 + $0x10] sm:$0xff] %v1084_v12  ;;  %v985_v4 = vadd.f32 %v2076_v6, %v984_v17 }
 0x2c7   :  { %v1034_v46 = vadd.f32 %v1033_v26, %v985_v4 }
 0x2c9   :  { %v1069_v18 = vmul.f32 0.01, %v1034_v46 }
 0x2cb   :  { %v1085_v40 = vmax.f32 %v1034_v46, %v1069_v18 }
 0x2cc   :  { %v987_v19 = vpop.f32.mrf.mxu3  ;;  %v1036_v56 = vpop.f32.mrf.mxu0 }
 0x2cd   :  { %1101 = vst [vmem:[%s2147_s5 + $0x18] sm:$0xff] %v1085_v40  ;;  %v988_v49 = vadd.f32 %v2076_v6, %v987_v19 }
 0x2cf   :  { %v1037_v41 = vadd.f32 %v1036_v56, %v988_v49 }
 0x2d1   :  { %v1070_v29 = vmul.f32 0.01, %v1037_v41 }
 0x2d3   :  { %v1086_v0 = vmax.f32 %v1037_v41, %v1070_v29 }
 0x2d4   :  { %v989_v45 = vpop.f32.mrf.mxu3  ;;  %v1038_v1 = vpop.f32.mrf.mxu0 }
 0x2d5   :  { %1102 = vst [vmem:[%s2147_s5 + $0x20] sm:$0xff] %v1086_v0  ;;  %v990_v33 = vadd.f32 %v2076_v6, %v989_v45 }
 0x2d7   :  { %v1039_v43 = vadd.f32 %v1038_v1, %v990_v33 }
 0x2d9   :  { %v1071_v28 = vmul.f32 0.01, %v1039_v43 }
 0x2db   :  { %v1087_v62 = vmax.f32 %v1039_v43, %v1071_v28 }
 0x2dc   :  { %v992_v15 = vpop.f32.mrf.mxu3  ;;  %v1041_v37 = vpop.f32.mrf.mxu0 }
 0x2dd   :  { %1103 = vst [vmem:[%s2147_s5 + $0x28] sm:$0xff] %v1087_v62  ;;  %v993_v7 = vadd.f32 %v2076_v6, %v992_v15 }
 0x2df   :  { %v1042_v36 = vadd.f32 %v1041_v37, %v993_v7 }
 0x2e1   :  { %v1072_v61 = vmul.f32 0.01, %v1042_v36 }
 0x2e3   :  { %v1088_v50 = vmax.f32 %v1042_v36, %v1072_v61 }
 0x2e4   :  { %v994_v25 = vpop.f32.mrf.mxu3  ;;  %v1043_v57 = vpop.f32.mrf.mxu0 }
 0x2e5   :  { %1104 = vst [vmem:[%s2147_s5 + $0x30] sm:$0xff] %v1088_v50  ;;  %v995_v38 = vadd.f32 %v2076_v6, %v994_v25 }
 0x2e7   :  { %v1044_v52 = vadd.f32 %v1043_v57, %v995_v38 }
 0x2e9   :  { %v1073_v53 = vmul.f32 0.01, %v1044_v52 }
 0x2eb   :  { %v1089_v35 = vmax.f32 %v1044_v52, %v1073_v53 }
 0x2ec   :  { %v997_v34 = vpop.f32.mrf.mxu3  ;;  %v1046_v2 = vpop.f32.mrf.mxu0 }
 0x2ed   :  { %1105 = vst [vmem:[%s2147_s5 + $0x38] sm:$0xff] %v1089_v35  ;;  %v998_v55 = vadd.f32 %v2076_v6, %v997_v34 }
 0x2ef   :  { %v1047_v31 = vadd.f32 %v1046_v2, %v998_v55 }
 0x2f1   :  { %v1074_v23 = vmul.f32 0.01, %v1047_v31 }
 0x2f3   :  { %v1090_v11 = vmax.f32 %v1047_v31, %v1074_v23 }
 0x2f4   :  { %v999_v32 = vpop.f32.mrf.mxu3  ;;  %v1048_v42 = vpop.f32.mrf.mxu0 }
 0x2f5   :  { %1106 = vst [vmem:[%s2147_s5 + $0x40] sm:$0xff] %v1090_v11  ;;  %v1000_v20 = vadd.f32 %v2076_v6, %v999_v32 }
 0x2f7   :  { %v1049_v58 = vadd.f32 %v1048_v42, %v1000_v20 }
 0x2f9   :  { %v1075_v16 = vmul.f32 0.01, %v1049_v58 }
 0x2fb   :  { %v1091_v21 = vmax.f32 %v1049_v58, %v1075_v16 }
 0x2fc   :  { %v1002_v63 = vpop.f32.mrf.mxu3  ;;  %v1051_v13 = vpop.f32.mrf.mxu0 }
 0x2fd   :  { %1107 = vst [vmem:[%s2147_s5 + $0x48] sm:$0xff] %v1091_v21  ;;  %v1003_v8 = vadd.f32 %v2076_v6, %v1002_v63 }
 0x2ff   :  { %v1052_v44 = vadd.f32 %v1051_v13, %v1003_v8 }
 0x301   :  { %v1076_v22 = vmul.f32 0.01, %v1052_v44 }
 0x303   :  { %v1092_v54 = vmax.f32 %v1052_v44, %v1076_v22 }
 0x304   :  { %v1004_v24 = vpop.f32.mrf.mxu3  ;;  %v1053_v30 = vpop.f32.mrf.mxu0 }
 0x305   :  { %1108 = vst [vmem:[%s2147_s5 + $0x50] sm:$0xff] %v1092_v54  ;;  %v1005_v27 = vadd.f32 %v2076_v6, %v1004_v24 }
 0x307   :  { %v1054_v39 = vadd.f32 %v1053_v30, %v1005_v27 }
 0x309   :  { %v1077_v47 = vmul.f32 0.01, %v1054_v39 }
 0x30b   :  { %v1093_v3 = vmax.f32 %v1054_v39, %v1077_v47 }
 0x30c   :  { %v1007_v5 = vpop.f32.mrf.mxu3  ;;  %v1056_v60 = vpop.f32.mrf.mxu0 }
 0x30d   :  { %1109 = vst [vmem:[%s2147_s5 + $0x58] sm:$0xff] %v1093_v3  ;;  %v1008_v59 = vadd.f32 %v2076_v6, %v1007_v5 }
 0x30f   :  { %v1057_v51 = vadd.f32 %v1056_v60, %v1008_v59 }
 0x311   :  { %v1078_v48 = vmul.f32 0.01, %v1057_v51 }
 0x313   :  { %v1094_v14 = vmax.f32 %v1057_v51, %v1078_v48 }
 0x314   :  { %v1009_v10 = vpop.f32.mrf.mxu3  ;;  %v1058_v9 = vpop.f32.mrf.mxu0 }
 0x315   :  { %1110 = vst [vmem:[%s2147_s5 + $0x60] sm:$0xff] %v1094_v14  ;;  %v1010_v12 = vadd.f32 %v2076_v6, %v1009_v10 }
 0x317   :  { %v1059_v17 = vadd.f32 %v1058_v9, %v1010_v12 }
 0x319   :  { %v1079_v26 = vmul.f32 0.01, %v1059_v17 }
 0x31b   :  { %v1095_v4 = vmax.f32 %v1059_v17, %v1079_v26 }
 0x31c   :  { %v1012_v46 = vpop.f32.mrf.mxu3  ;;  %v1061_v18 = vpop.f32.mrf.mxu0 }
 0x31d   :  { %1111 = vst [vmem:[%s2147_s5 + $0x68] sm:$0xff] %v1095_v4  ;;  %v1013_v40 = vadd.f32 %v2076_v6, %v1012_v46 }
 0x31f   :  { %v1062_v19 = vadd.f32 %v1061_v18, %v1013_v40 }
 0x321   :  { %v1080_v56 = vmul.f32 0.01, %v1062_v19 }
 0x323   :  { %v1096_v49 = vmax.f32 %v1062_v19, %v1080_v56 }
 0x324   :  { %v1014_v41 = vpop.f32.mrf.mxu3  ;;  %v1063_v0 = vpop.f32.mrf.mxu0 }
 0x325   :  { %1112 = vst [vmem:[%s2147_s5 + $0x70] sm:$0xff] %v1096_v49  ;;  %v1015_v29 = vadd.f32 %v2076_v6, %v1014_v41 }
 0x327   :  { %v1064_v45 = vadd.f32 %v1063_v0, %v1015_v29 }
 0x329   :  { %v1081_v1 = vmul.f32 0.01, %v1064_v45 }
 0x32b   :  { %v1097_v33 = vmax.f32 %v1064_v45, %v1081_v1 }
 0x32d   :  { %1113 = vst [vmem:[%s2147_s5 + $0x78] sm:$0xff] %v1097_v33 }

</bundles_post_ra>
